<compile_context>
chip_gen: v7x
topology: tpu7x:2x2x1
jax: 0.10.0
libtpu: 0.0.40
codegen_flags: <defaults>
</compile_context>

<pallas_src>
import math

import jax
import jax.numpy as jnp
from jax.experimental import pallas as pl
from jax.experimental.pallas import tpu as pltpu

LN_EPS = 1e-5


def _round_up(x, m):
    return (x + m - 1) // m * m


# ---------------------------------- Pallas kernel ----------------------------------
def attention_decoder_kernel(x_ref, w_ee_ref, vec_ref, w_out_ref, b_out_ref, o_ref):
    f32 = jnp.float32
    bf16 = jnp.bfloat16
    inv_e = 1.0 / x_ref.shape[-1]

    # --- LayerNorm(z): fused single-pass statistics, all in f32 ---
    x = x_ref[...].astype(f32)
    s1 = jnp.sum(x, axis=-1, keepdims=True)
    s2 = jnp.sum(x * x, axis=-1, keepdims=True)
    mean = s1 * inv_e
    var = s2 * inv_e - mean * mean
    h = (x - mean) * jax.lax.rsqrt(var + LN_EPS)
    h = h * vec_ref[0:1, :] + vec_ref[1:2, :]          # gamma, beta (read at use-site)

    # --- MultiheadAttention with a single query / single key-value position ---
    # softmax over one key == 1.0 exactly, so attn_out == out_proj(v_proj(h)).
    v = jnp.dot(h.astype(bf16), w_ee_ref[0], preferred_element_type=f32) + vec_ref[2:3, :]
    a = jnp.dot(v.astype(bf16), w_ee_ref[1], preferred_element_type=f32) + vec_ref[3:4, :]

    # --- output_proj: (tb, E) @ (E, ts_pad); lane-dense (128-multiple) store ---
    out = jnp.dot(a.astype(bf16), w_out_ref[...], preferred_element_type=f32) + b_out_ref[...]
    o_ref[...] = out.astype(o_ref.dtype)


# ------------------------------ parameter construction ------------------------------
def make_params(key, ts_dim, output_dim):
    """Build packed decoder params.

    Returns (w_ee, vecs, w_out, b_out):
      w_ee : (2, E, E)  bf16  rows = [Wv^T, Wo^T]  (pre-transposed to (in, out))
      vecs : (8, E)     f32   rows 0..3 = [ln_gamma, ln_beta, bv, bo]  (rows 4..7 pad)
      w_out: (E, ts_pad) bf16 = Wproj^T zero-padded on the lane dim to a 128 multiple
      b_out: (1, ts_pad) f32  = bproj zero-padded
    """
    E = output_dim
    ts_pad = _round_up(ts_dim, 128)
    keys = jax.random.split(key, 6)
    bound = 1.0 / math.sqrt(E)

    def uni(k, shape):
        return jax.random.uniform(k, shape, jnp.float32, -bound, bound)

    # Only the v-slice of in_proj and out_proj reach the output (seq_len == 1), so the
    # learned query and Wq/Wk/bq/bk are never materialized.
    wv, bv = uni(keys[0], (E, E)), uni(keys[1], (E,))        # v-projection
    wo, bo = uni(keys[2], (E, E)), uni(keys[3], (E,))        # attention out_proj
    wp, bp = uni(keys[4], (ts_dim, E)), uni(keys[5], (ts_dim,))  # output_proj
    gamma = jnp.ones((E,), jnp.float32)                       # nn.LayerNorm default init
    beta = jnp.zeros((E,), jnp.float32)

    w_ee = jnp.stack([wv.T, wo.T]).astype(jnp.bfloat16)
    vecs = jnp.zeros((8, E), jnp.float32)
    vecs = vecs.at[0].set(gamma).at[1].set(beta).at[2].set(bv).at[3].set(bo)
    w_out = jnp.zeros((E, ts_pad), jnp.bfloat16).at[:, :ts_dim].set(wp.T.astype(jnp.bfloat16))
    b_out = jnp.zeros((1, ts_pad), jnp.float32).at[0, :ts_dim].set(bp)
    return (w_ee, vecs, w_out, b_out)


# ----------------------------------- wrapper -----------------------------------
def attention_decoder_forward(z, params, ts_dim, *, block_batch=256):
    w_ee, vecs, w_out, b_out = params
    B, E = z.shape
    ts_pad = w_out.shape[1]

    # Batch tiling (multiple of 8 sublanes); pad batch, slice back afterwards.
    tb = min(block_batch, _round_up(B, 8))
    Bp = _round_up(B, tb)
    if Bp != B:
        z = jnp.pad(z, ((0, Bp - B), (0, 0)))
    grid = (Bp // tb,)

    # VMEM budget: resident weights + double-buffered activation / output tiles.
    def nbytes(a):
        return a.size * a.dtype.itemsize

    weight_bytes = sum(nbytes(a) for a in (w_ee, vecs, w_out, b_out))
    tile_bytes = tb * E * 4 + tb * ts_pad * 4
    footprint = weight_bytes + 2 * tile_bytes
    vmem_limit = int(min(max(4 * footprint, 8 << 20), 64 << 20))  # v7x-safe cap

    out = pl.pallas_call(
        attention_decoder_kernel,
        out_shape=jax.ShapeDtypeStruct((Bp, ts_pad), jnp.float32),
        grid_spec=pltpu.PrefetchScalarGridSpec(
            num_scalar_prefetch=0,
            grid=grid,
            in_specs=[
                pl.BlockSpec((tb, E), lambda i: (i, 0)),            # activations: tiled over batch
                pl.BlockSpec((2, E, E), lambda i: (0, 0, 0)),       # weights: constant -> resident
                pl.BlockSpec((8, E), lambda i: (0, 0)),
                pl.BlockSpec((E, ts_pad), lambda i: (0, 0)),
                pl.BlockSpec((1, ts_pad), lambda i: (0, 0)),
            ],
            out_specs=pl.BlockSpec((tb, ts_pad), lambda i: (i, 0)),
        ),
        compiler_params=pltpu.CompilerParams(
            dimension_semantics=("parallel",),
            vmem_limit_bytes=vmem_limit,
        ),
    )(z, w_ee, vecs, w_out, b_out)
    return out[:B, :ts_dim]


# ------------------------------ pure-JAX reference ------------------------------
def attention_decoder_reference(z, params, ts_dim):
    w_ee, vecs, w_out, b_out = params
    bf16, f32 = jnp.bfloat16, jnp.float32
    x = z.astype(f32)
    mean = jnp.mean(x, axis=-1, keepdims=True)
    var = jnp.mean((x - mean) ** 2, axis=-1, keepdims=True)
    h = (x - mean) * jax.lax.rsqrt(var + LN_EPS) * vecs[0:1] + vecs[1:2]
    v = jnp.dot(h.astype(bf16), w_ee[0], preferred_element_type=f32) + vecs[2:3]
    a = jnp.dot(v.astype(bf16), w_ee[1], preferred_element_type=f32) + vecs[3:4]
    out = jnp.dot(a.astype(bf16), w_out, preferred_element_type=f32) + b_out
    return out[:, :ts_dim]


# ------------------------------------- main -------------------------------------
if __name__ == "__main__":
    batch = 8
    output_dim = 32   # embed_dim E; divisible by num_heads=4 (heads do not change the math)
    ts_dim = 16       # reconstructed time-series dimension

    key = jax.random.PRNGKey(0)
    kz, kp = jax.random.split(key)
    z = jax.random.normal(kz, (batch, output_dim), dtype=jnp.float32)
    params = make_params(kp, ts_dim, output_dim)

    out = attention_decoder_forward(z, params, ts_dim)
    out = jax.block_until_ready(out)

    assert out.shape == (batch, ts_dim), out.shape
    assert jnp.all(jnp.isfinite(out))
    ref = attention_decoder_reference(z, params, ts_dim)
    max_err = float(jnp.max(jnp.abs(out - ref)))
    assert jnp.allclose(out, ref, rtol=5e-2, atol=5e-2), max_err
    print("KERNEL_OK")
</pallas_src>

<mosaic_0001>
module attributes {stable_mosaic.version = 11 : i64} {
  func.func @attention_decoder_kernel(%arg0: i32, %arg1: memref<8x32xf32, #tpu.memory_space<vmem>>, %arg2: memref<2x32x32xbf16, #tpu.memory_space<vmem>>, %arg3: memref<8x32xf32, #tpu.memory_space<vmem>>, %arg4: memref<32x128xbf16, #tpu.memory_space<vmem>>, %arg5: memref<1x128xf32, #tpu.memory_space<vmem>>, %arg6: memref<8x128xf32, #tpu.memory_space<vmem>>) attributes {dimension_semantics = [#tpu.dimension_semantics<parallel>], iteration_bounds = array<i64: 1>, scalar_prefetch = 0 : i64, scratch_operands = 0 : i64, tpu.core_type = #tpu.core_type<tc>, window_params = [{transform_indices = @transform_0, window_bounds = array<i64: 8, 32>}, {pipeline_mode = #tpu.pipeline_mode<synchronous>, transform_indices = @transform_1, window_bounds = array<i64: 2, 32, 32>}, {pipeline_mode = #tpu.pipeline_mode<synchronous>, transform_indices = @transform_2, window_bounds = array<i64: 8, 32>}, {pipeline_mode = #tpu.pipeline_mode<synchronous>, transform_indices = @transform_3, window_bounds = array<i64: 32, 128>}, {pipeline_mode = #tpu.pipeline_mode<synchronous>, transform_indices = @transform_4, window_bounds = array<i64: 1, 128>}, {transform_indices = @transform_5, window_bounds = array<i64: 8, 128>}]} {
    %c0 = arith.constant 0 : index
    %c0_0 = arith.constant 0 : index
    %0 = vector.load %arg1[%c0, %c0_0] : memref<8x32xf32, #tpu.memory_space<vmem>>, vector<8x32xf32>
    %cst = arith.constant dense<0.000000e+00> : vector<8xf32>
    %1 = vector.multi_reduction <add>, %0, %cst [1] : vector<8x32xf32> to vector<8xf32>
    %2 = vector.shape_cast %1 : vector<8xf32> to vector<8x1xf32>
    %3 = arith.mulf %0, %0 : vector<8x32xf32>
    %cst_1 = arith.constant dense<0.000000e+00> : vector<8xf32>
    %4 = vector.multi_reduction <add>, %3, %cst_1 [1] : vector<8x32xf32> to vector<8xf32>
    %5 = vector.shape_cast %4 : vector<8xf32> to vector<8x1xf32>
    %cst_2 = arith.constant 3.125000e-02 : f32
    %6 = vector.broadcast %cst_2 : f32 to vector<8x1xf32>
    %7 = arith.mulf %2, %6 : vector<8x1xf32>
    %cst_3 = arith.constant 3.125000e-02 : f32
    %8 = vector.broadcast %cst_3 : f32 to vector<8x1xf32>
    %9 = arith.mulf %5, %8 : vector<8x1xf32>
    %10 = arith.mulf %7, %7 : vector<8x1xf32>
    %11 = arith.subf %9, %10 : vector<8x1xf32>
    %12 = vector.broadcast %7 : vector<8x1xf32> to vector<8x32xf32>
    %13 = arith.subf %0, %12 : vector<8x32xf32>
    %cst_4 = arith.constant 9.99999974E-6 : f32
    %14 = vector.broadcast %cst_4 : f32 to vector<8x1xf32>
    %15 = arith.addf %11, %14 : vector<8x1xf32>
    %16 = math.rsqrt %15 : vector<8x1xf32>
    %17 = vector.broadcast %16 : vector<8x1xf32> to vector<8x32xf32>
    %18 = arith.mulf %13, %17 : vector<8x32xf32>
    %c0_5 = arith.constant 0 : index
    %c0_6 = arith.constant 0 : index
    %19 = vector.load %arg3[%c0_5, %c0_6] : memref<8x32xf32, #tpu.memory_space<vmem>>, vector<1x32xf32>
    %20 = vector.broadcast %19 : vector<1x32xf32> to vector<8x32xf32>
    %21 = arith.mulf %18, %20 : vector<8x32xf32>
    %c1 = arith.constant 1 : index
    %c0_7 = arith.constant 0 : index
    %22 = vector.load %arg3[%c1, %c0_7] : memref<8x32xf32, #tpu.memory_space<vmem>>, vector<1x32xf32>
    %23 = vector.broadcast %22 : vector<1x32xf32> to vector<8x32xf32>
    %24 = arith.addf %21, %23 : vector<8x32xf32>
    %25 = arith.truncf %24 : vector<8x32xf32> to vector<8x32xbf16>
    %c0_8 = arith.constant 0 : index
    %c0_9 = arith.constant 0 : index
    %c0_10 = arith.constant 0 : index
    %26 = vector.load %arg2[%c0_8, %c0_9, %c0_10] : memref<2x32x32xbf16, #tpu.memory_space<vmem>>, vector<1x32x32xbf16>
    %27 = vector.shape_cast %26 : vector<1x32x32xbf16> to vector<32x32xbf16>
    %cst_11 = arith.constant dense<0.000000e+00> : vector<8x32xf32>
    %28 = tpu.matmul %25, %27, %cst_11 {dimension_numbers = #tpu.dot_dimension_numbers<[1], [0], [0], [1], [0, 0, 1, 1], [], []>} : vector<8x32xbf16>, vector<32x32xbf16>, vector<8x32xf32> -> vector<8x32xf32>
    %c2 = arith.constant 2 : index
    %c0_12 = arith.constant 0 : index
    %29 = vector.load %arg3[%c2, %c0_12] : memref<8x32xf32, #tpu.memory_space<vmem>>, vector<1x32xf32>
    %30 = vector.broadcast %29 : vector<1x32xf32> to vector<8x32xf32>
    %31 = arith.addf %28, %30 : vector<8x32xf32>
    %32 = arith.truncf %31 : vector<8x32xf32> to vector<8x32xbf16>
    %c1_13 = arith.constant 1 : index
    %c0_14 = arith.constant 0 : index
    %c0_15 = arith.constant 0 : index
    %33 = vector.load %arg2[%c1_13, %c0_14, %c0_15] : memref<2x32x32xbf16, #tpu.memory_space<vmem>>, vector<1x32x32xbf16>
    %34 = vector.shape_cast %33 : vector<1x32x32xbf16> to vector<32x32xbf16>
    %cst_16 = arith.constant dense<0.000000e+00> : vector<8x32xf32>
    %35 = tpu.matmul %32, %34, %cst_16 {dimension_numbers = #tpu.dot_dimension_numbers<[1], [0], [0], [1], [0, 0, 1, 1], [], []>} : vector<8x32xbf16>, vector<32x32xbf16>, vector<8x32xf32> -> vector<8x32xf32>
    %c3 = arith.constant 3 : index
    %c0_17 = arith.constant 0 : index
    %36 = vector.load %arg3[%c3, %c0_17] : memref<8x32xf32, #tpu.memory_space<vmem>>, vector<1x32xf32>
    %37 = vector.broadcast %36 : vector<1x32xf32> to vector<8x32xf32>
    %38 = arith.addf %35, %37 : vector<8x32xf32>
    %39 = arith.truncf %38 : vector<8x32xf32> to vector<8x32xbf16>
    %c0_18 = arith.constant 0 : index
    %c0_19 = arith.constant 0 : index
    %40 = vector.load %arg4[%c0_18, %c0_19] : memref<32x128xbf16, #tpu.memory_space<vmem>>, vector<32x128xbf16>
    %cst_20 = arith.constant dense<0.000000e+00> : vector<8x128xf32>
    %41 = tpu.matmul %39, %40, %cst_20 {dimension_numbers = #tpu.dot_dimension_numbers<[1], [0], [0], [1], [0, 0, 1, 1], [], []>} : vector<8x32xbf16>, vector<32x128xbf16>, vector<8x128xf32> -> vector<8x128xf32>
    %c0_21 = arith.constant 0 : index
    %c0_22 = arith.constant 0 : index
    %42 = vector.load %arg5[%c0_21, %c0_22] : memref<1x128xf32, #tpu.memory_space<vmem>>, vector<1x128xf32>
    %43 = vector.broadcast %42 : vector<1x128xf32> to vector<8x128xf32>
    %44 = arith.addf %41, %43 : vector<8x128xf32>
    %c0_23 = arith.constant 0 : index
    %c0_24 = arith.constant 0 : index
    %45 = vector.load %arg6[%c0_23, %c0_24] : memref<8x128xf32, #tpu.memory_space<vmem>>, vector<8x128xf32>
    tpu.vector_store %arg6[%c0_23, %c0_24], %44 {strides = array<i32>} : memref<8x128xf32, #tpu.memory_space<vmem>>, vector<8x128xf32>,
    return
  }
  func.func @transform_0(%arg0: i32) -> (i32, i32) {
    %c0_i32 = arith.constant 0 : i32
    %c0_i32_0 = arith.constant 0 : i32
    return %arg0, %c0_i32 : i32, i32
  }
  func.func @transform_1(%arg0: i32) -> (i32, i32, i32) {
    %c0_i32 = arith.constant 0 : i32
    %c0_i32_0 = arith.constant 0 : i32
    %c0_i32_1 = arith.constant 0 : i32
    %c0_i32_2 = arith.constant 0 : i32
    return %c0_i32, %c0_i32_0, %c0_i32_1 : i32, i32, i32
  }
  func.func @transform_2(%arg0: i32) -> (i32, i32) {
    %c0_i32 = arith.constant 0 : i32
    %c0_i32_0 = arith.constant 0 : i32
    %c0_i32_1 = arith.constant 0 : i32
    return %c0_i32, %c0_i32_0 : i32, i32
  }
  func.func @transform_3(%arg0: i32) -> (i32, i32) {
    %c0_i32 = arith.constant 0 : i32
    %c0_i32_0 = arith.constant 0 : i32
    %c0_i32_1 = arith.constant 0 : i32
    return %c0_i32, %c0_i32_0 : i32, i32
  }
  func.func @transform_4(%arg0: i32) -> (i32, i32) {
    %c0_i32 = arith.constant 0 : i32
    %c0_i32_0 = arith.constant 0 : i32
    %c0_i32_1 = arith.constant 0 : i32
    return %c0_i32, %c0_i32_0 : i32, i32
  }
  func.func @transform_5(%arg0: i32) -> (i32, i32) {
    %c0_i32 = arith.constant 0 : i32
    %c0_i32_0 = arith.constant 0 : i32
    return %arg0, %c0_i32 : i32, i32
  }
}

</mosaic_0001>

<bundles_post_ra>
// kernel: tpu_custom_call.1
= control target key start
LH: loop header
LB: loop body
LE: loop exit
PB: predicated region body
PF: predicated region fallthrough
CT: control target
= control target key end

     0   :  { %10 = vsyncpa [#allocation3], 0  ;;  %s616_s0 = inlined_call_operand.hbm [shape: f32[8,32], index: 0, kind: input, shape index: {}]   ;;  %s617_s1 = inlined_call_operand.hbm [shape: bf16[2,32,32], index: 1, kind: input, shape index: {}]   ;;  %s618_s2 = inlined_call_operand.hbm [shape: f32[8,32], index: 2, kind: input, shape index: {}]   ;;  %s619_s3 = inlined_call_operand.hbm [shape: bf16[32,128], index: 3, kind: input, shape index: {}]   ;;  %s620_s4 = inlined_call_operand.vmem [shape: f32[1,128], index: 4, kind: input, shape index: {}]   ;;  %s621_s5 = inlined_call_operand.hbm [shape: f32[8,128], index: 5, kind: output, shape index: {}]  }
   0x1   :  { %11 = vsyncpa [#allocation6], 0 }
   0x2   :  { %12 = vsyncpa [#allocation9], 0 }
   0x3   :  { %13 = vsyncpa [#allocation4], 0  ;;  %s500_s18 = smov [#allocation5]   ;;  %s382_s22 = scalar_lea.hbm %s617_s1, 512 }
   0x4   :  { %s29_s19 = sshll.u32 %s500_s18, 4  ;;  %p383_p0 = scmp.ne.s32.totalorder %s617_s1, %s382_s22  ;;  %s30_s19 = int_to_ptr.vmem [resolvable:$true] %s29_s19 }
   0x5   :  { %p386_p1 = scmp.lt.u32.totalorder %s382_s22, %s617_s1 }
   0x7   :  { %p388_p2 = pnand %p386_p1, %p383_p0 }
   0x9   :  { %391 = shalt.err (!%p388_p2)
}
   0xa   :  { %s392_s27 = scalar_lea.vmem %s30_s19, 512  ;;  %p397_p4 = scmp.lt.s32.totalorder %s30_s19, %s30_s19 }
   0xb   :  { %p393_p3 = scmp.ne.s32.totalorder %s30_s19, %s392_s27  ;;  %p398_p5 = scmp.lt.s32.totalorder %s392_s27, %s392_s27 }
   0xd   :  { %p399_p6 = por %p398_p5, %p397_p4 }
   0xf   :  { %p400_p7 = pnand %p399_p6, %p393_p3 }
  0x11   :  { %403 = shalt.err (!%p400_p7)
}
  0x12   :  { %s501_s28 = smov 64   ;;  %s502_s29 = smov 4  }
  0x13   :  { %35 = dma.hbm_to_vmem [thread:$0]  %s617_s1, 512, %s30_s19, [#allocation6], %s501_s28, %s501_s28, %s502_s29  }
  0x14   :  { %s503_s7 = smov [#allocation2]   ;;  %s504_s9 = smov [#allocation7]  }
  0x15   :  { %s20_s8 = sshll.u32 %s503_s7, 4  ;;  %s42_s10 = sshll.u32 %s504_s9, 4  ;;  %s21_s8 = int_to_ptr.vmem [resolvable:$true] %s20_s8  ;;  %s43_s10 = int_to_ptr.vmem [resolvable:$true] %s42_s10 }
  0x16   :  { %s404_s13 = scalar_lea.hbm %s616_s0, 128 }
  0x17   :  { %p405_p8 = scmp.ne.s32.totalorder %s616_s0, %s404_s13  ;;  %p408_p9 = scmp.lt.u32.totalorder %s404_s13, %s616_s0 }
  0x19   :  { %p410_p10 = pnand %p408_p9, %p405_p8 }
  0x1b   :  { %413 = shalt.err (!%p410_p10)
}
  0x1c   :  { %s414_s1 = scalar_lea.vmem %s21_s8, 128  ;;  %p419_p12 = scmp.lt.s32.totalorder %s21_s8, %s21_s8 }
  0x1d   :  { %p415_p11 = scmp.ne.s32.totalorder %s21_s8, %s414_s1  ;;  %p420_p13 = scmp.lt.s32.totalorder %s414_s1, %s414_s1 }
  0x1f   :  { %p421_p0 = por %p420_p13, %p419_p12 }
  0x21   :  { %p422_p1 = pnand %p421_p0, %p415_p11 }
  0x23   :  { %425 = shalt.err (!%p422_p1)
}
  0x24   :  { %23 = dma.hbm_to_vmem [thread:$0]  %s616_s0, 128, %s21_s8, [#allocation3]  }
  0x25   :  { %s426_s22 = scalar_lea.hbm %s618_s2, 128 }
  0x26   :  { %p427_p2 = scmp.ne.s32.totalorder %s618_s2, %s426_s22  ;;  %p430_p3 = scmp.lt.u32.totalorder %s426_s22, %s618_s2 }
  0x28   :  { %p432_p4 = pnand %p430_p3, %p427_p2 }
  0x2a   :  { %435 = shalt.err (!%p432_p4)
}
  0x2b   :  { %s436_s27 = scalar_lea.vmem %s43_s10, 128  ;;  %p441_p6 = scmp.lt.s32.totalorder %s43_s10, %s43_s10 }
  0x2c   :  { %p437_p5 = scmp.ne.s32.totalorder %s43_s10, %s436_s27  ;;  %p442_p7 = scmp.lt.s32.totalorder %s436_s27, %s436_s27 }
  0x2e   :  { %p443_p8 = por %p442_p7, %p441_p6 }
  0x30   :  { %p444_p9 = pnand %p443_p8, %p437_p5 }
  0x32   :  { %447 = shalt.err (!%p444_p9)
}
  0x33   :  { %45 = dma.hbm_to_vmem [thread:$0]  %s618_s2, 128, %s43_s10, [#allocation6]  }
  0x34   :  { %s505_s6 = smov [#allocation8]   ;;  %s448_s11 = scalar_lea.hbm %s619_s3, 256 }
  0x35   :  { %s51_s7 = sshll.u32 %s505_s6, 4  ;;  %p449_p10 = scmp.ne.s32.totalorder %s619_s3, %s448_s11  ;;  %s52_s7 = int_to_ptr.vmem [resolvable:$true] %s51_s7 }
  0x36   :  { %p452_p11 = scmp.lt.u32.totalorder %s448_s11, %s619_s3 }
  0x38   :  { %p454_p12 = pnand %p452_p11, %p449_p10 }
  0x3a   :  { %457 = shalt.err (!%p454_p12)
}
  0x3b   :  { %s458_s16 = scalar_lea.vmem %s52_s7, 256  ;;  %p463_p0 = scmp.lt.s32.totalorder %s52_s7, %s52_s7 }
  0x3c   :  { %p459_p13 = scmp.ne.s32.totalorder %s52_s7, %s458_s16  ;;  %p464_p1 = scmp.lt.s32.totalorder %s458_s16, %s458_s16 }
  0x3e   :  { %p465_p2 = por %p464_p1, %p463_p0 }
  0x40   :  { %p466_p3 = pnand %p465_p2, %p459_p13 }
  0x42   :  { %469 = shalt.err (!%p466_p3)
}
  0x43   :  { %57 = dma.hbm_to_vmem [thread:$0]  %s619_s3, 256, %s52_s7, [#allocation9], %s501_s28, %s501_s28, %s502_s29  }
  0x44   :  { %492 = dma.done.wait [#allocation3], 128  }
  0x45   :  { %493 = vsyncadd [#allocation3], 4294967168 }
  0x46   :  { %494 = dma.done.wait [#allocation6], 640  }
  0x47   :  { %495 = vsyncadd [#allocation6], 4294966656 }
  0x48   :  { %496 = dma.done.wait [#allocation9], 256  }
  0x49   :  { %497 = vsyncadd [#allocation9], 4294967040  ;;  %vm74_vm0 = vcmask 261120   ;;  %v73_v0 = vld [vmem:[#allocation2] sm:$0xff]  ;;  %v374_v4 = vld [vmem:[#allocation5] sm:$0xff]   ;;  %v506_v5 = vmov 0.0  }
  0x4a   :  { %v75_v1 = vsel %vm74_vm0, %v73_v0, 0.0  ;;  %v78_v2 = vmul.f32 %v73_v0, %v73_v0  ;;  %341 = vmatprep.subr.bf16.mxu0 %v506_v5  ;;  %vm507_vm1 = vmmov 0   ;;  %v375_v6 = vld [vmem:[#allocation5 + $0x8] sm:$0xff]   ;;  %349 = vmatprep.subr.bf16.mxu1 %v506_v5  ;;  %v376_v7 = vld [vmem:[#allocation5 + $0x10] sm:$0xff]   ;;  %v318_v17 = vld [vmem:[#allocation7] ss:$0 sm:$0xff] }
  0x4b   :  { %76 = vadd.xlane.f32.xlu0 %v75_v1  ;;  %345 = vmatprep.mubr.msk.bf16.mxu0 %vm507_vm1, %v506_v5  ;;  %v319_v19 = vld [vmem:[#allocation7 + $0x1] ss:$0 sm:$0xff]  ;;  %v377_v23 = vld [vmem:[#allocation5 + $0x18] sm:$0xff]   ;;  %v378_v24 = vld [vmem:[#allocation8] sm:$0xff]   ;;  %s508_s29 = smov [#allocation10]  }
  0x4c   :  { %v79_v3 = vsel %vm74_vm0, %v78_v2, 0.0  ;;  %342 = vmatpush3.bf16.msra.mxu0 %v374_v4  ;;  %353 = vmatprep.mubr.msk.bf16.mxu1 %vm507_vm1, %v506_v5  ;;  %v320_v25 = vld [vmem:[#allocation7 + $0x2] ss:$0 sm:$0xff]  ;;  %v379_v32 = vld [vmem:[#allocation8 + $0x8] sm:$0xff]   ;;  %v324_v33 = vld [vmem:[#allocation7 + $0x3] ss:$0 sm:$0xff] }
  0x4d   :  { %343 = vmatprep.subr.bf16.mxu0 %v506_v5  ;;  %350 = vmatpush3.bf16.msra.mxu1 %v376_v7  ;;  %v328_v40 = vld [vmem:[%s620_s4] ss:$0 sm:$0xff]  ;;  %s307_s17 = sshll.u32 %s508_s29, 4  ;;  %s308_s17 = int_to_ptr.vmem [resolvable:$true] %s307_s17 }
  0x4e   :  { %351 = vmatprep.subr.bf16.mxu1 %v506_v5  ;;  %s470_s1 = scalar_lea.vmem %s308_s17, 128  ;;  %p475_p5 = scmp.lt.s32.totalorder %s308_s17, %s308_s17 }
  0x4f   :  { %80 = vadd.xlane.f32.xlu0 %v79_v3  ;;  %p471_p4 = scmp.ne.s32.totalorder %s308_s17, %s470_s1  ;;  %p476_p6 = scmp.lt.s32.totalorder %s470_s1, %s470_s1 }
  0x50   :  { %344 = vmatpush3.bf16.msra.mxu0 %v375_v6 }
  0x51   :  { %357 = vmatprep.subr.bf16.mxu0 %v506_v5  ;;  %352 = vmatpush3.bf16.msra.mxu1 %v377_v23  ;;  %p477_p7 = por %p476_p6, %p475_p5 }
  0x53   :  { %p478_p8 = pnand %p477_p7, %p471_p4 }
  0xd8   :  { %v77_v8 = vpop.xlane.xlu0 %76 }
  0xd9   :  { %v82_v9 = vmul.f32 0.03125, %v77_v8 }
  0xdb   :  { %v84_v11 = vmul.f32 %v82_v9, %v82_v9  ;;  %v86_v15 = vsub.f32 %v73_v0, %v82_v9 }
  0xdc   :  { %v81_v10 = vpop.xlane.xlu0 %80 }
  0xdd   :  { %v83_v12 = vmul.f32 0.03125, %v81_v10 }
  0xdf   :  { %v85_v13 = vsub.f32 %v83_v12, %v84_v11 }
  0xe1   :  { %v87_v14 = vadd.f32 1e-05, %v85_v13 }
  0xe3   :  { %380 = vrsqrt.f32 %v87_v14 }
  0xed   :  { %v381_v16 = vpop.eup %380 }
  0xee   :  { %v89_v18 = vmul.f32 %v381_v16, %v86_v15 }
  0xf0   :  { %v95_v20 = vmul.f32 %v318_v17, %v89_v18 }
  0xf2   :  { %v101_v21 = vadd.f32 %v319_v19, %v95_v20 }
  0xf4   :  { %v102_v22 = vpack.c.bf16 %v101_v21, %v101_v21 }
  0xf6   :  { %346 = vmatmul.mubr.msk.bf16.vlgmr.msra.gmra.mrb[0].mxu0 %vm74_vm0, %v102_v22 }
  0xf7   :  { %361 = vmatprep.mubr.msk.bf16.mxu0 %vm507_vm1, %v506_v5  ;;  %358 = vmatpush3.bf16.msra.mxu0 %v378_v24 }
  0xf8   :  { %359 = vmatprep.subr.bf16.mxu0 %v506_v5 }
  0xfb   :  { %360 = vmatpush3.bf16.msra.mxu0 %v379_v32 }
 0x1c9   :  { %v161_v26 = vpop.f32.mrb[0].mxu0 }
 0x1ca   :  { %v162_v27 = vadd.f32 %v320_v25, %v161_v26  ;;  %v347_v28 = vpop.f32.mrb[1].mxu0 }
 0x1cb   :  { %v164_v29 = vpop.f32.mrb[2].mxu0 }
 0x1cc   :  { %v167_v30 = vpack.c.bf16 %v162_v27, %v162_v27  ;;  %v348_v31 = vpop.f32.mrb[3].mxu0 }
 0x1ce   :  { %354 = vmatmul.mubr.msk.bf16.vlgmr.msra.gmra.mrb[0].mxu1 %vm74_vm0, %v167_v30 }
 0x2a1   :  { %v227_v34 = vpop.f32.mrb[0].mxu1 }
 0x2a2   :  { %v228_v35 = vadd.f32 %v324_v33, %v227_v34  ;;  %v355_v36 = vpop.f32.mrb[1].mxu1 }
 0x2a3   :  { %v230_v37 = vpop.f32.mrb[2].mxu1 }
 0x2a4   :  { %v233_v38 = vpack.c.bf16 %v228_v35, %v228_v35  ;;  %v356_v39 = vpop.f32.mrb[3].mxu1 }
 0x2a6   :  { %362 = vmatmul.mubr.msk.bf16.vlgmr.msra.gmra.mrb[4].mxu0 %vm74_vm0, %v233_v38 }
 0x379   :  { %v294_v41 = vpop.f32.mrb[4].mxu0 }
 0x37a   :  { %v295_v42 = vadd.f32 %v328_v40, %v294_v41  ;;  %v363_v43 = vpop.f32.mrb[5].mxu0 }
 0x37b   :  { %v297_v44 = vpop.f32.mrb[6].mxu0 }
 0x37c   :  { %300 = vst [vmem:[#allocation10] sm:$0xff] %v295_v42  ;;  %v364_v45 = vpop.f32.mrb[7].mxu0 }
 0x37d   :  { %481 = shalt.err (!%p478_p8)
}
 0x37e   :  { %s482_s4 = scalar_lea.hbm %s621_s5, 128 }
 0x37f   :  { %p483_p9 = scmp.ne.s32.totalorder %s621_s5, %s482_s4  ;;  %p486_p10 = scmp.lt.u32.totalorder %s482_s4, %s621_s5 }
 0x381   :  { %p488_p11 = pnand %p486_p10, %p483_p9 }
 0x383   :  { %491 = shalt.err (!%p488_p11)
}
 0x384   :  { %310 = dma.vmem_to_hbm [thread:$0]  %s308_s17, 128, %s621_s5, [#allocation4]  }
 0x385   :  { %498 = dma.done.wait [#allocation4], 128  }
 0x386   :  { %499 = vsyncadd [#allocation4], 4294967168 }
 0x387   :  { %314 = vsyncpa [#allocation3], 1 }
 0x388   :  { %315 = vsyncpa [#allocation6], 1 }
 0x389   :  { %316 = vsyncpa [#allocation9], 1 }
 0x38a   :  { %317 = vsyncpa [#allocation4], 1 }

</bundles_post_ra>
